<compile_context>
chip_gen: v7x
topology: tpu7x:2x2x1
jax: 0.10.0
libtpu: 0.0.40
codegen_flags: <defaults>
</compile_context>

<pallas_src>
import jax
import jax.numpy as jnp
from jax.experimental import pallas as pl
from jax.experimental.pallas import tpu as pltpu


def _round_up(x, m):
    return ((x + m - 1) // m) * m


def ffm_kernel(tu_ref, ti_ref, iu_ref, ii_ref, o_ref):
    # tu_ref / ti_ref: (Dp, Tp) augmented transposed tables, constant across the grid.
    #     column t of tu = [emb1[t, :], fc[t], 1,     1   ]^T
    #     column t of ti = [emb0[t, :], 1,     fc[t], bias]^T
    # iu_ref / ii_ref: (1, Nb) int32 feature indices, batch packed along lanes.
    # o_ref:           (1, Nb) f32 results (single wide lane-dense store).
    Tp = tu_ref.shape[1]
    Nb = iu_ref.shape[1]

    # One-hot encodings for the whole block: feature axis on sublanes, batch on lanes.
    t_iota = jax.lax.broadcasted_iota(jnp.int32, (Tp, Nb), 0)
    oh_u = (t_iota == iu_ref[...]).astype(tu_ref.dtype)        # (Tp, Nb)
    oh_i = (t_iota == ii_ref[...]).astype(ti_ref.dtype)        # (Tp, Nb)

    # One fused MXU gather per table per grid step, f32 accumulation.
    vu = jnp.dot(tu_ref[...], oh_u, preferred_element_type=jnp.float32)   # (Dp, Nb)
    vi = jnp.dot(ti_ref[...], oh_i, preferred_element_type=jnp.float32)   # (Dp, Nb)

    # sum_d emb1[u]*emb0[i] + fc[u] + fc[i] + bias  (augmentation rows supply the
    # linear term and bias).  Single wide store, lane-dense.
    o_ref[...] = jnp.sum(vu * vi, axis=0, keepdims=True).astype(o_ref.dtype)


def make_params(key, user_num, item_num, factor_num):
    total = user_num + item_num
    k_fc, k_e0, k_e1 = jax.random.split(key, 3)
    # torch.nn.Embedding default init: N(0, 1)
    fc_w = jax.random.normal(k_fc, (total, 1), dtype=jnp.float32)
    bias = jnp.zeros((1,), dtype=jnp.float32)
    # xavier_uniform_ for the FFM embedding tables
    bound = (6.0 / (total + factor_num)) ** 0.5
    emb0 = jax.random.uniform(k_e0, (total, factor_num), minval=-bound, maxval=bound,
                              dtype=jnp.float32)
    emb1 = jax.random.uniform(k_e1, (total, factor_num), minval=-bound, maxval=bound,
                              dtype=jnp.float32)
    return {"user_num": user_num, "fc_w": fc_w, "bias": bias, "emb0": emb0, "emb1": emb1}


def ffm_forward(params, user, item, features=None, logits=True,
                mxu_dtype=jnp.float32):
    # `features` is unused, matching the PyTorch forward.
    # mxu_dtype=jnp.bfloat16 enables the bf16 MXU path (recommended on v6e/v7x);
    # accumulation stays f32, table values are rounded to bf16.
    del features
    user_num = params["user_num"]
    emb0, emb1 = params["emb0"], params["emb1"]
    fc_w, bias = params["fc_w"], params["bias"]
    T, D = emb0.shape
    B = user.shape[0]

    L = 128                                   # lane width: batch packed along lanes
    Tp = _round_up(T, 128)                    # feature axis padded for clean lane layout
    Dp = _round_up(D + 3, 8)                  # embed axis + [fc, ones, bias] rows -> sublanes

    # Augmented, transposed tables (tiny; VMEM-resident, copied once by the pipeline).
    ones_row = jnp.ones((1, T), jnp.float32)
    bias_row = jnp.full((1, T), bias[0], dtype=jnp.float32)
    tu = jnp.concatenate([emb1.T, fc_w.T, ones_row, ones_row], axis=0)   # (D+3, T)
    ti = jnp.concatenate([emb0.T, ones_row, fc_w.T, bias_row], axis=0)   # (D+3, T)
    tu = jnp.pad(tu, ((0, Dp - (D + 3)), (0, Tp - T))).astype(mxu_dtype)
    ti = jnp.pad(ti, ((0, Dp - (D + 3)), (0, Tp - T))).astype(mxu_dtype)

    # Batch tiling: lane-dense (1, Nb) blocks, Nb = bt_rows*128 elements per grid step.
    # bt_rows capped so both (Tp, Nb) one-hot intermediates fit ~8 MiB of VMEM; tile
    # count kept even (>1) so v7x's 2 TensorCores get balanced "parallel" work.
    rows_total = pl.cdiv(B, L)
    onehot_bytes_per_row = 2 * Tp * L * jnp.dtype(mxu_dtype).itemsize
    bt_rows = max(1, min(32, rows_total, (8 << 20) // max(onehot_bytes_per_row, 1)))
    num_tiles = pl.cdiv(rows_total, bt_rows)
    if num_tiles > 1 and num_tiles % 2 == 1:
        num_tiles += 1
        bt_rows = pl.cdiv(rows_total, num_tiles)
        num_tiles = pl.cdiv(rows_total, bt_rows)
    block_b = bt_rows * L
    Bp = num_tiles * block_b

    idx_u = jnp.pad(user.astype(jnp.int32), (0, Bp - B)).reshape(1, Bp)
    idx_i = jnp.pad(item.astype(jnp.int32) + user_num, (0, Bp - B)).reshape(1, Bp)

    flops = 4 * Dp * Tp * Bp                                   # 2 MXU dots per block
    bytes_accessed = 3 * Bp * 4 + 2 * Dp * Tp * jnp.dtype(mxu_dtype).itemsize

    out = pl.pallas_call(
        ffm_kernel,
        out_shape=jax.ShapeDtypeStruct((1, Bp), jnp.float32),
        grid=(num_tiles,),
        in_specs=[
            pl.BlockSpec((Dp, Tp), lambda i: (0, 0)),          # tu (copied once, constant)
            pl.BlockSpec((Dp, Tp), lambda i: (0, 0)),          # ti (copied once, constant)
            pl.BlockSpec((1, block_b), lambda i: (0, i)),      # user indices (lane-dense)
            pl.BlockSpec((1, block_b), lambda i: (0, i)),      # item indices (offset)
        ],
        out_specs=pl.BlockSpec((1, block_b), lambda i: (0, i)),
        compiler_params=pltpu.CompilerParams(
            dimension_semantics=("parallel",),
            vmem_limit_bytes=32 * 1024 * 1024,                 # safe on v5e/v6e/v7x
        ),
        cost_estimate=pl.CostEstimate(flops=flops, transcendentals=0,
                                      bytes_accessed=bytes_accessed),
    )(tu, ti, idx_u, idx_i)

    out = out[0, :B]                           # drop batch padding -> (B,)
    return out if logits else jax.nn.sigmoid(out)


def ffm_reference(params, user, item, logits=True):
    user_num = params["user_num"]
    idx_u = user
    idx_i = item + user_num
    lin = params["fc_w"][idx_u] + params["fc_w"][idx_i] + params["bias"]      # (B, 1)
    ffm = jnp.sum(params["emb1"][idx_u] * params["emb0"][idx_i],
                  axis=-1, keepdims=True)                                      # (B, 1)
    out = (lin + ffm)[:, 0]
    return out if logits else jax.nn.sigmoid(out)


if __name__ == "__main__":
    user_num, item_num, factor_num = 10, 20, 32

    key = jax.random.PRNGKey(0)
    k_p, k_u, k_i, k_f = jax.random.split(key, 4)
    params = make_params(k_p, user_num, item_num, factor_num)

    # Small case (toy shapes implied by the module).
    B = 8
    user = jax.random.randint(k_u, (B,), 0, user_num, dtype=jnp.int32)
    item = jax.random.randint(k_i, (B,), 0, item_num, dtype=jnp.int32)
    features = jax.random.normal(k_f, (B, 4), dtype=jnp.float32)  # unused, as in PyTorch

    out = jax.block_until_ready(ffm_forward(params, user, item, features, logits=True))
    ref = ffm_reference(params, user, item, logits=True)
    assert out.shape == (B,)
    assert jnp.allclose(out, ref, atol=1e-5, rtol=1e-5)

    # Larger case: single large lane-dense tile + sigmoid head + padding path.
    B2 = 3000
    k_u2, k_i2 = jax.random.split(jax.random.PRNGKey(1), 2)
    user2 = jax.random.randint(k_u2, (B2,), 0, user_num, dtype=jnp.int32)
    item2 = jax.random.randint(k_i2, (B2,), 0, item_num, dtype=jnp.int32)
    out2 = jax.block_until_ready(ffm_forward(params, user2, item2, None, logits=False))
    ref2 = ffm_reference(params, user2, item2, logits=False)
    assert out2.shape == (B2,)
    assert jnp.allclose(out2, ref2, atol=1e-5, rtol=1e-5)

    # Multi-tile case: exercises the parallel grid (even tile count) + lane blocking.
    B3 = 10000
    k_u3, k_i3 = jax.random.split(jax.random.PRNGKey(2), 2)
    user3 = jax.random.randint(k_u3, (B3,), 0, user_num, dtype=jnp.int32)
    item3 = jax.random.randint(k_i3, (B3,), 0, item_num, dtype=jnp.int32)
    out3 = jax.block_until_ready(ffm_forward(params, user3, item3, None, logits=True))
    ref3 = ffm_reference(params, user3, item3, logits=True)
    assert out3.shape == (B3,)
    assert jnp.allclose(out3, ref3, atol=1e-5, rtol=1e-5)

    # bf16 MXU path (v6e/v7x recommendation from the perf review): tables/one-hots in
    # bf16, f32 accumulation; looser tolerance since table values are bf16-rounded.
    out_bf = jax.block_until_ready(
        ffm_forward(params, user2, item2, None, logits=True, mxu_dtype=jnp.bfloat16))
    ref_bf = ffm_reference(params, user2, item2, logits=True)
    assert jnp.allclose(out_bf, ref_bf, atol=3e-2, rtol=3e-2)

    print("KERNEL_OK")
</pallas_src>

<mosaic_0001>
module attributes {stable_mosaic.version = 11 : i64} {
  func.func @ffm_kernel(%arg0: i32, %arg1: memref<40x128xf32, #tpu.memory_space<vmem>>, %arg2: memref<40x128xf32, #tpu.memory_space<vmem>>, %arg3: memref<1x128xi32, #tpu.memory_space<vmem>>, %arg4: memref<1x128xi32, #tpu.memory_space<vmem>>, %arg5: memref<1x128xf32, #tpu.memory_space<vmem>>) attributes {dimension_semantics = [#tpu.dimension_semantics<parallel>], iteration_bounds = array<i64: 1>, scalar_prefetch = 0 : i64, scratch_operands = 0 : i64, tpu.core_type = #tpu.core_type<tc>, window_params = [{pipeline_mode = #tpu.pipeline_mode<synchronous>, transform_indices = @transform_0, window_bounds = array<i64: 40, 128>}, {pipeline_mode = #tpu.pipeline_mode<synchronous>, transform_indices = @transform_1, window_bounds = array<i64: 40, 128>}, {transform_indices = @transform_2, window_bounds = array<i64: 1, 128>}, {transform_indices = @transform_3, window_bounds = array<i64: 1, 128>}, {transform_indices = @transform_4, window_bounds = array<i64: 1, 128>}]} {
    %0 = tpu.iota {dimensions = array<i32: 0>} : vector<128x128xi32>
    %c0 = arith.constant 0 : index
    %c0_0 = arith.constant 0 : index
    %1 = vector.load %arg3[%c0, %c0_0] : memref<1x128xi32, #tpu.memory_space<vmem>>, vector<1x128xi32>
    %2 = vector.broadcast %1 : vector<1x128xi32> to vector<128x128xi32>
    %3 = arith.cmpi eq, %0, %2 : vector<128x128xi32>
    %4 = arith.extui %3 : vector<128x128xi1> to vector<128x128xi32>
    %5 = arith.sitofp %4 : vector<128x128xi32> to vector<128x128xf32>
    %c0_1 = arith.constant 0 : index
    %c0_2 = arith.constant 0 : index
    %6 = vector.load %arg4[%c0_1, %c0_2] : memref<1x128xi32, #tpu.memory_space<vmem>>, vector<1x128xi32>
    %7 = vector.broadcast %6 : vector<1x128xi32> to vector<128x128xi32>
    %8 = arith.cmpi eq, %0, %7 : vector<128x128xi32>
    %9 = arith.extui %8 : vector<128x128xi1> to vector<128x128xi32>
    %10 = arith.sitofp %9 : vector<128x128xi32> to vector<128x128xf32>
    %c0_3 = arith.constant 0 : index
    %c0_4 = arith.constant 0 : index
    %11 = vector.load %arg1[%c0_3, %c0_4] : memref<40x128xf32, #tpu.memory_space<vmem>>, vector<40x128xf32>
    %cst = arith.constant dense<0.000000e+00> : vector<40x128xf32>
    %12 = tpu.matmul %11, %5, %cst {dimension_numbers = #tpu.dot_dimension_numbers<[1], [0], [0], [1], [0, 0, 1, 1], [], []>} : vector<40x128xf32>, vector<128x128xf32>, vector<40x128xf32> -> vector<40x128xf32>
    %c0_5 = arith.constant 0 : index
    %c0_6 = arith.constant 0 : index
    %13 = vector.load %arg2[%c0_5, %c0_6] : memref<40x128xf32, #tpu.memory_space<vmem>>, vector<40x128xf32>
    %cst_7 = arith.constant dense<0.000000e+00> : vector<40x128xf32>
    %14 = tpu.matmul %13, %10, %cst_7 {dimension_numbers = #tpu.dot_dimension_numbers<[1], [0], [0], [1], [0, 0, 1, 1], [], []>} : vector<40x128xf32>, vector<128x128xf32>, vector<40x128xf32> -> vector<40x128xf32>
    %15 = arith.mulf %12, %14 : vector<40x128xf32>
    %cst_8 = arith.constant dense<0.000000e+00> : vector<128xf32>
    %16 = vector.multi_reduction <add>, %15, %cst_8 [0] : vector<40x128xf32> to vector<128xf32>
    %17 = vector.shape_cast %16 : vector<128xf32> to vector<1x128xf32>
    %c0_9 = arith.constant 0 : index
    %c0_10 = arith.constant 0 : index
    %18 = vector.load %arg5[%c0_9, %c0_10] : memref<1x128xf32, #tpu.memory_space<vmem>>, vector<1x128xf32>
    tpu.vector_store %arg5[%c0_9, %c0_10], %17 {strides = array<i32>} : memref<1x128xf32, #tpu.memory_space<vmem>>, vector<1x128xf32>,
    return
  }
  func.func @transform_0(%arg0: i32) -> (i32, i32) {
    %c0_i32 = arith.constant 0 : i32
    %c0_i32_0 = arith.constant 0 : i32
    %c0_i32_1 = arith.constant 0 : i32
    return %c0_i32, %c0_i32_0 : i32, i32
  }
  func.func @transform_1(%arg0: i32) -> (i32, i32) {
    %c0_i32 = arith.constant 0 : i32
    %c0_i32_0 = arith.constant 0 : i32
    %c0_i32_1 = arith.constant 0 : i32
    return %c0_i32, %c0_i32_0 : i32, i32
  }
  func.func @transform_2(%arg0: i32) -> (i32, i32) {
    %c0_i32 = arith.constant 0 : i32
    %c0_i32_0 = arith.constant 0 : i32
    return %c0_i32, %arg0 : i32, i32
  }
  func.func @transform_3(%arg0: i32) -> (i32, i32) {
    %c0_i32 = arith.constant 0 : i32
    %c0_i32_0 = arith.constant 0 : i32
    return %c0_i32, %arg0 : i32, i32
  }
  func.func @transform_4(%arg0: i32) -> (i32, i32) {
    %c0_i32 = arith.constant 0 : i32
    %c0_i32_0 = arith.constant 0 : i32
    return %c0_i32, %arg0 : i32, i32
  }
}

</mosaic_0001>

<bundles_post_ra>
// kernel: tpu_custom_call.1
= control target key start
LH: loop header
LB: loop body
LE: loop exit
PB: predicated region body
PF: predicated region fallthrough
CT: control target
= control target key end

     0   :  { %9 = vsyncpa [#allocation3], 0  ;;  %s905_s0 = inlined_call_operand.hbm [shape: f32[40,128], index: 0, kind: input, shape index: {}]   ;;  %s906_s1 = inlined_call_operand.hbm [shape: f32[40,128], index: 1, kind: input, shape index: {}]   ;;  %s907_s2 = inlined_call_operand.vmem [shape: s32[1,128], index: 2, kind: input, shape index: {}]   ;;  %s908_s3 = inlined_call_operand.vmem [shape: s32[1,128], index: 3, kind: input, shape index: {}]   ;;  %s909_s4 = inlined_call_operand.hbm [shape: f32[1,128], index: 4, kind: output, shape index: {}]  }
   0x1   :  { %10 = vsyncpa [#allocation6], 0 }
   0x2   :  { %11 = vsyncpa [#allocation4], 0  ;;  %s722_s15 = smov [#allocation2]   ;;  %s650_s19 = scalar_lea.hbm %s905_s0, 640 }
   0x3   :  { %s17_s16 = sshll.u32 %s722_s15, 4  ;;  %p651_p0 = scmp.ne.s32.totalorder %s905_s0, %s650_s19  ;;  %s18_s16 = int_to_ptr.vmem [resolvable:$true] %s17_s16 }
   0x4   :  { %p654_p1 = scmp.lt.u32.totalorder %s650_s19, %s905_s0 }
   0x6   :  { %p656_p2 = pnand %p654_p1, %p651_p0 }
   0x8   :  { %659 = shalt.err (!%p656_p2)
}
   0x9   :  { %s660_s24 = scalar_lea.vmem %s18_s16, 640  ;;  %p665_p4 = scmp.lt.s32.totalorder %s18_s16, %s18_s16 }
   0xa   :  { %p661_p3 = scmp.ne.s32.totalorder %s18_s16, %s660_s24  ;;  %p666_p5 = scmp.lt.s32.totalorder %s660_s24, %s660_s24 }
   0xc   :  { %p667_p6 = por %p666_p5, %p665_p4 }
   0xe   :  { %p668_p7 = pnand %p667_p6, %p661_p3 }
  0x10   :  { %671 = shalt.err (!%p668_p7)
}
  0x11   :  { %s723_s25 = smov 128   ;;  %s724_s26 = smov 8  }
  0x12   :  { %23 = dma.hbm_to_vmem [thread:$0]  %s905_s0, 640, %s18_s16, [#allocation3], %s723_s25, %s723_s25, %s724_s26  }
  0x13   :  { %s725_s29 = smov [#allocation5]   ;;  %s672_s7 = scalar_lea.hbm %s906_s1, 640 }
  0x14   :  { %s29_s30 = sshll.u32 %s725_s29, 4  ;;  %p673_p8 = scmp.ne.s32.totalorder %s906_s1, %s672_s7  ;;  %s30_s30 = int_to_ptr.vmem [resolvable:$true] %s29_s30 }
  0x15   :  { %p676_p9 = scmp.lt.u32.totalorder %s672_s7, %s906_s1 }
  0x17   :  { %p678_p10 = pnand %p676_p9, %p673_p8 }
  0x19   :  { %681 = shalt.err (!%p678_p10)
}
  0x1a   :  { %s682_s12 = scalar_lea.vmem %s30_s30, 640  ;;  %p687_p12 = scmp.lt.s32.totalorder %s30_s30, %s30_s30 }
  0x1b   :  { %p683_p11 = scmp.ne.s32.totalorder %s30_s30, %s682_s12  ;;  %p688_p13 = scmp.lt.s32.totalorder %s682_s12, %s682_s12 }
  0x1d   :  { %p689_p0 = por %p688_p13, %p687_p12 }
  0x1f   :  { %p690_p1 = pnand %p689_p0, %p683_p11 }
  0x21   :  { %693 = shalt.err (!%p690_p1)
}
  0x22   :  { %35 = dma.hbm_to_vmem [thread:$0]  %s906_s1, 640, %s30_s30, [#allocation6], %s723_s25, %s723_s25, %s724_s26  }
  0x23   :  { %716 = dma.done.wait [#allocation3], 640  }
  0x24   :  { %717 = vsyncadd [#allocation3], 4294966656 }
  0x25   :  { %718 = dma.done.wait [#allocation6], 640  }
  0x26   :  { %719 = vsyncadd [#allocation6], 4294966656  ;;  %v46_v0 = vlaneseq  ;;  %v726_v1 = vmov 0.0|0.0   ;;  %vm727_vm0 = vmmov 0   ;;  %v728_v3 = vmov 0.0   ;;  %v169_v22 = vld [vmem:[#allocation2] sm:$0xff] }
  0x27   :  { %593 = vmatprep.subr.bf16.mxu0 %v726_v1  ;;  %617 = vmatprep.subr.bf16.mxu1 %v726_v1  ;;  %v794_v7 = vld [vmem:[%s907_s2] ss:$0 sm:$0xff]  ;;  %v729_v11 = vmov 1.0|1.0   ;;  %v264_v23 = vld [vmem:[#allocation5] sm:$0xff]  ;;  %v265_v25 = vld [vmem:[#allocation5 + $0x8] sm:$0xff] }
  0x28   :  { %v782_v2 = vshrl.u32 %v46_v0, 7  ;;  %531 = vmatprep.mubr.msk.f32.mxu0 %vm727_vm0, %v728_v3  ;;  %578 = vmatprep.mubr.msk.f32.mxu1 %vm727_vm0, %v728_v3  ;;  %v799_v8 = vld [vmem:[%s908_s3] ss:$0 sm:$0xff]  ;;  %v170_v24 = vld [vmem:[#allocation2 + $0x8] sm:$0xff]  ;;  %v171_v26 = vld [vmem:[#allocation2 + $0x10] sm:$0xff]  ;;  %s730_s2 = smov [#allocation7]  }
  0x29   :  { %v266_v27 = vld [vmem:[#allocation5 + $0x10] sm:$0xff]  ;;  %v267_v29 = vld [vmem:[#allocation5 + $0x18] sm:$0xff]  ;;  %v268_v31 = vld [vmem:[#allocation5 + $0x20] sm:$0xff]  ;;  %s381_s3 = sshll.u32 %s730_s2, 4  ;;  %s382_s3 = int_to_ptr.vmem [resolvable:$true] %s381_s3 }
  0x2a   :  { %v48_v4 = vadd.s32 8, %v782_v2  ;;  %v49_v5 = vadd.s32 16, %v782_v2  ;;  %v50_v6 = vadd.s32 24, %v782_v2  ;;  %v51_v9 = vadd.s32 32, %v782_v2  ;;  %v172_v28 = vld [vmem:[#allocation2 + $0x18] sm:$0xff]  ;;  %v173_v30 = vld [vmem:[#allocation2 + $0x20] sm:$0xff]  ;;  %p699_p3 = scmp.lt.s32.totalorder %s382_s3, %s382_s3 }
  0x2b   :  { %v52_v10 = vadd.s32 40, %v782_v2  ;;  %vm68_vm1 = vcmp.eq.s32.totalorder %v782_v2, %v794_v7  ;;  %vm121_vm3 = vcmp.eq.s32.totalorder %v782_v2, %v799_v8  ;;  %v53_v12 = vadd.s32 48, %v782_v2  ;;  %s694_s17 = scalar_lea.vmem %s382_s3, 16  ;;  %s698_s18 = scalar_lea.vmem %s382_s3, 32 }
  0x2c   :  { %vm69_vm2 = vcmp.eq.s32.totalorder %v48_v4, %v794_v7  ;;  %vm122_vm4 = vcmp.eq.s32.totalorder %v48_v4, %v799_v8  ;;  %vm70_vm6 = vcmp.eq.s32.totalorder %v49_v5, %v794_v7  ;;  %vm71_vm7 = vcmp.eq.s32.totalorder %v50_v6, %v794_v7  ;;  %p695_p2 = scmp.ne.s32.totalorder %s382_s3, %s694_s17  ;;  %p700_p4 = scmp.lt.s32.totalorder %s698_s18, %s694_s17 }
  0x2d   :  { %vm594_vm5 = vmpackc.low %vm69_vm2, %vm68_vm1  ;;  %vm123_vm8 = vcmp.eq.s32.totalorder %v49_v5, %v799_v8  ;;  %vm124_vm9 = vcmp.eq.s32.totalorder %v50_v6, %v799_v8  ;;  %vm72_vm13 = vcmp.eq.s32.totalorder %v51_v9, %v794_v7  ;;  %vm73_vm14 = vcmp.eq.s32.totalorder %v52_v10, %v794_v7 }
  0x2e   :  { %595 = vmatpush3.bf16.msk.msra.mxu0 %vm594_vm5, %v729_v11  ;;  %vm618_vm10 = vmpackc.low %vm122_vm4, %vm121_vm3  ;;  %v54_v13 = vadd.s32 56, %v782_v2  ;;  %vm125_vm15 = vcmp.eq.s32.totalorder %v51_v9, %v799_v8  ;;  %vm126_vm1 = vcmp.eq.s32.totalorder %v52_v10, %v799_v8  ;;  %vm74_vm4 = vcmp.eq.s32.totalorder %v53_v12, %v794_v7  ;;  %p701_p5 = por %p700_p4, %p699_p3 }
  0x2f   :  { %619 = vmatpush3.bf16.msk.msra.mxu1 %vm618_vm10, %v729_v11  ;;  %596 = vmatprep.subr.bf16.mxu0 %v726_v1  ;;  %vm597_vm11 = vmpackc.low %vm71_vm7, %vm70_vm6  ;;  %v55_v14 = vadd.s32 64, %v782_v2  ;;  %v56_v15 = vadd.s32 72, %v782_v2  ;;  %vm127_vm6 = vcmp.eq.s32.totalorder %v53_v12, %v799_v8  ;;  %v57_v16 = vadd.s32 80, %v782_v2 }
  0x30   :  { %620 = vmatprep.subr.bf16.mxu1 %v726_v1  ;;  %vm621_vm12 = vmpackc.low %vm124_vm9, %vm123_vm8  ;;  %vm75_vm5 = vcmp.eq.s32.totalorder %v54_v13, %v794_v7  ;;  %vm128_vm7 = vcmp.eq.s32.totalorder %v54_v13, %v799_v8  ;;  %v58_v17 = vadd.s32 88, %v782_v2  ;;  %v59_v18 = vadd.s32 96, %v782_v2  ;;  %p702_p6 = pnand %p701_p5, %p695_p2 }
  0x31   :  { %vm600_vm2 = vmpackc.low %vm73_vm14, %vm72_vm13  ;;  %vm76_vm10 = vcmp.eq.s32.totalorder %v55_v14, %v794_v7  ;;  %vm130_vm13 = vcmp.eq.s32.totalorder %v56_v15, %v799_v8  ;;  %v60_v19 = vadd.s32 104, %v782_v2  ;;  %v61_v20 = vadd.s32 112, %v782_v2 }
  0x32   :  { %598 = vmatpush3.bf16.msk.msra.mxu0 %vm597_vm11, %v729_v11  ;;  %vm624_vm3 = vmpackc.low %vm126_vm1, %vm125_vm15  ;;  %vm77_vm11 = vcmp.eq.s32.totalorder %v56_v15, %v794_v7  ;;  %vm78_vm1 = vcmp.eq.s32.totalorder %v57_v16, %v794_v7  ;;  %v62_v21 = vadd.s32 120, %v782_v2 }
  0x33   :  { %622 = vmatpush3.bf16.msk.msra.mxu1 %vm621_vm12, %v729_v11  ;;  %599 = vmatprep.subr.bf16.mxu0 %v726_v1  ;;  %vm603_vm8 = vmpackc.low %vm75_vm5, %vm74_vm4  ;;  %vm129_vm12 = vcmp.eq.s32.totalorder %v55_v14, %v799_v8  ;;  %vm132_vm4 = vcmp.eq.s32.totalorder %v58_v17, %v799_v8 }
  0x34   :  { %623 = vmatprep.subr.bf16.mxu1 %v726_v1  ;;  %vm627_vm9 = vmpackc.low %vm128_vm7, %vm127_vm6  ;;  %vm80_vm7 = vcmp.eq.s32.totalorder %v59_v18, %v794_v7 }
  0x35   :  { %vm606_vm14 = vmpackc.low %vm77_vm11, %vm76_vm10  ;;  %vm134_vm10 = vcmp.eq.s32.totalorder %v60_v19, %v799_v8 }
  0x36   :  { %601 = vmatpush3.bf16.msk.msra.mxu0 %vm600_vm2, %v729_v11  ;;  %vm630_vm15 = vmpackc.low %vm130_vm13, %vm129_vm12  ;;  %vm79_vm2 = vcmp.eq.s32.totalorder %v58_v17, %v794_v7  ;;  %vm82_vm13 = vcmp.eq.s32.totalorder %v61_v20, %v794_v7 }
  0x37   :  { %625 = vmatpush3.bf16.msk.msra.mxu1 %vm624_vm3, %v729_v11  ;;  %602 = vmatprep.subr.bf16.mxu0 %v726_v1  ;;  %vm131_vm3 = vcmp.eq.s32.totalorder %v57_v16, %v799_v8  ;;  %vm609_vm5 = vmpackc.low %vm79_vm2, %vm78_vm1  ;;  %vm136_vm1 = vcmp.eq.s32.totalorder %v62_v21, %v799_v8 }
  0x38   :  { %626 = vmatprep.subr.bf16.mxu1 %v726_v1  ;;  %vm633_vm6 = vmpackc.low %vm132_vm4, %vm131_vm3 }
  0x3a   :  { %604 = vmatpush3.bf16.msk.msra.mxu0 %vm603_vm8, %v729_v11  ;;  %vm81_vm8 = vcmp.eq.s32.totalorder %v60_v19, %v794_v7 }
  0x3b   :  { %628 = vmatpush3.bf16.msk.msra.mxu1 %vm627_vm9, %v729_v11  ;;  %605 = vmatprep.subr.bf16.mxu0 %v726_v1  ;;  %vm133_vm9 = vcmp.eq.s32.totalorder %v59_v18, %v799_v8  ;;  %vm612_vm11 = vmpackc.low %vm81_vm8, %vm80_vm7 }
  0x3c   :  { %629 = vmatprep.subr.bf16.mxu1 %v726_v1  ;;  %vm636_vm12 = vmpackc.low %vm134_vm10, %vm133_vm9 }
  0x3e   :  { %607 = vmatpush3.bf16.msk.msra.mxu0 %vm606_vm14, %v729_v11  ;;  %vm83_vm14 = vcmp.eq.s32.totalorder %v62_v21, %v794_v7 }
  0x3f   :  { %631 = vmatpush3.bf16.msk.msra.mxu1 %vm630_vm15, %v729_v11  ;;  %608 = vmatprep.subr.bf16.mxu0 %v726_v1  ;;  %vm135_vm15 = vcmp.eq.s32.totalorder %v61_v20, %v799_v8  ;;  %vm615_vm2 = vmpackc.low %vm83_vm14, %vm82_vm13 }
  0x40   :  { %632 = vmatprep.subr.bf16.mxu1 %v726_v1  ;;  %vm639_vm3 = vmpackc.low %vm136_vm1, %vm135_vm15 }
  0x42   :  { %610 = vmatpush3.bf16.msk.msra.mxu0 %vm609_vm5, %v729_v11 }
  0x43   :  { %634 = vmatpush3.bf16.msk.msra.mxu1 %vm633_vm6, %v729_v11  ;;  %611 = vmatprep.subr.bf16.mxu0 %v726_v1 }
  0x44   :  { %635 = vmatprep.subr.bf16.mxu1 %v726_v1 }
  0x46   :  { %613 = vmatpush3.bf16.msk.msra.mxu0 %vm612_vm11, %v729_v11 }
  0x47   :  { %637 = vmatpush3.bf16.msk.msra.mxu1 %vm636_vm12, %v729_v11  ;;  %614 = vmatprep.subr.bf16.mxu0 %v726_v1 }
  0x48   :  { %638 = vmatprep.subr.bf16.mxu1 %v726_v1 }
  0x4a   :  { %616 = vmatpush3.bf16.msk.msra.mxu0 %vm615_vm2, %v729_v11 }
  0x4b   :  { %640 = vmatpush3.bf16.msk.msra.mxu1 %vm639_vm3, %v729_v11 }
  0x4d   :  { %532 = vmatmul.mubr.f32.vlgmr.msra.gmra.mrb[0].mxu0 %v169_v22 }
  0x4e   :  { %579 = vmatmul.mubr.f32.vlgmr.msra.gmra.mrb[0].mxu1 %v264_v23  ;;  %534 = vmatprep.mubr.msk.f32.mxu0 %vm727_vm0, %v728_v3 }
  0x4f   :  { %581 = vmatprep.mubr.msk.f32.mxu1 %vm727_vm0, %v728_v3 }
  0x51   :  { %535 = vmatmul.mubr.f32.gmra.mrb[2].mxu0 %v170_v24 }
  0x52   :  { %582 = vmatmul.mubr.f32.gmra.mrb[2].mxu1 %v265_v25  ;;  %537 = vmatprep.mubr.msk.f32.mxu0 %vm727_vm0, %v728_v3 }
  0x53   :  { %584 = vmatprep.mubr.msk.f32.mxu1 %vm727_vm0, %v728_v3 }
  0x55   :  { %538 = vmatmul.mubr.f32.gmra.mrb[4].mxu0 %v171_v26 }
  0x56   :  { %585 = vmatmul.mubr.f32.gmra.mrb[4].mxu1 %v266_v27  ;;  %540 = vmatprep.mubr.msk.f32.mxu0 %vm727_vm0, %v728_v3 }
  0x57   :  { %587 = vmatprep.mubr.msk.f32.mxu1 %vm727_vm0, %v728_v3 }
  0x59   :  { %541 = vmatmul.mubr.f32.gmra.mrb[6].mxu0 %v172_v28 }
  0x5a   :  { %588 = vmatmul.mubr.f32.gmra.mrb[6].mxu1 %v267_v29  ;;  %543 = vmatprep.mubr.msk.f32.mxu0 %vm727_vm0, %v728_v3 }
  0x5b   :  { %590 = vmatprep.mubr.msk.f32.mxu1 %vm727_vm0, %v728_v3 }
  0x5d   :  { %544 = vmatmul.mubr.f32.gmra.mrb[8].mxu0 %v173_v30 }
  0x5e   :  { %591 = vmatmul.mubr.f32.gmra.mrb[8].mxu1 %v268_v31 }
 0x120   :  { %v240_v32 = vpop.f32.mrb[0].mxu0 }
 0x121   :  { %v335_v33 = vpop.f32.mrb[0].mxu1  ;;  %v533_v34 = vpop.f32.mrb[1].mxu0 }
 0x122   :  { %v359_v35 = vmul.f32 %v335_v33, %v240_v32  ;;  %v580_v36 = vpop.f32.mrb[1].mxu1 }
 0x124   :  { %v245_v37 = vpop.f32.mrb[2].mxu0 }
 0x125   :  { %v340_v38 = vpop.f32.mrb[2].mxu1  ;;  %v536_v39 = vpop.f32.mrb[3].mxu0 }
 0x126   :  { %v360_v40 = vmul.f32 %v340_v38, %v245_v37  ;;  %v583_v41 = vpop.f32.mrb[3].mxu1 }
 0x128   :  { %v364_v42 = vadd.f32 %v360_v40, %v359_v35  ;;  %v250_v43 = vpop.f32.mrb[4].mxu0 }
 0x129   :  { %v345_v44 = vpop.f32.mrb[4].mxu1  ;;  %v539_v45 = vpop.f32.mrb[5].mxu0 }
 0x12a   :  { %v361_v46 = vmul.f32 %v345_v44, %v250_v43  ;;  %v586_v47 = vpop.f32.mrb[5].mxu1 }
 0x12c   :  { %v365_v48 = vadd.f32 %v364_v42, %v361_v46  ;;  %v255_v49 = vpop.f32.mrb[6].mxu0 }
 0x12d   :  { %v350_v50 = vpop.f32.mrb[6].mxu1  ;;  %v542_v51 = vpop.f32.mrb[7].mxu0 }
 0x12e   :  { %v362_v52 = vmul.f32 %v350_v50, %v255_v49  ;;  %v589_v53 = vpop.f32.mrb[7].mxu1 }
 0x130   :  { %v366_v54 = vadd.f32 %v365_v48, %v362_v52  ;;  %v260_v55 = vpop.f32.mrb[8].mxu0 }
 0x131   :  { %v355_v56 = vpop.f32.mrb[8].mxu1  ;;  %v545_v57 = vpop.f32.mrb[9].mxu0 }
 0x132   :  { %v363_v58 = vmul.f32 %v355_v56, %v260_v55  ;;  %v592_v59 = vpop.f32.mrb[9].mxu1 }
 0x134   :  { %v367_v60 = vadd.f32 %v366_v54, %v363_v58 }
 0x136   :  { %v368_v61 = vrot.slane %v367_v60, 4 }
 0x138   :  { %v369_v62 = vadd.f32 %v368_v61, %v367_v60 }
 0x13a   :  { %v370_v63 = vrot.slane %v369_v62, 2 }
 0x13c   :  { %v371_v0 = vadd.f32 %v370_v63, %v369_v62 }
 0x13e   :  { %v372_v1 = vrot.slane %v371_v0, 1 }
 0x140   :  { %v373_v2 = vadd.f32 %v372_v1, %v371_v0 }
 0x142   :  { %374 = vst [vmem:[#allocation7] sm:$0x1] %v373_v2 }
 0x143   :  { %705 = shalt.err (!%p702_p6)
}
 0x144   :  { %s706_s21 = scalar_lea.hbm %s909_s4, 16 }
 0x145   :  { %p707_p7 = scmp.ne.s32.totalorder %s909_s4, %s706_s21  ;;  %p710_p8 = scmp.lt.u32.totalorder %s706_s21, %s909_s4 }
 0x147   :  { %p712_p9 = pnand %p710_p8, %p707_p7 }
 0x149   :  { %715 = shalt.err (!%p712_p9)
}
 0x14a   :  { %384 = dma.vmem_to_hbm [thread:$0]  %s382_s3, 16, %s909_s4, [#allocation4]  }
 0x14b   :  { %720 = dma.done.wait [#allocation4], 16  }
 0x14c   :  { %721 = vsyncadd [#allocation4], 4294967280 }
 0x14d   :  { %388 = vsyncpa [#allocation3], 1 }
 0x14e   :  { %389 = vsyncpa [#allocation6], 1 }
 0x14f   :  { %390 = vsyncpa [#allocation4], 1 }

</bundles_post_ra>
